<compile_context>
chip_gen: v5e
topology: v5e:2x2
jax: 0.10.0
libtpu: 0.0.40
codegen_flags: <defaults>
</compile_context>

<pallas_src>
import functools
import math

import jax
import jax.numpy as jnp
from jax.experimental import pallas as pl
from jax.experimental.pallas import tpu as pltpu


# --------------------------------------------------------------------------
# Kernel: one batch tile through the whole network.
# --------------------------------------------------------------------------
def _dqnet_kernel(x_ref, w1_ref, b1_ref, wh_ref, mh_ref, bh_ref,
                  we_ref, be_ref, out_ref, *, num_hidden: int):
    x = x_ref[...].astype(jnp.float32)

    # --- Layer 1: dense Linear + ReLU -------------------------------------
    h = jnp.dot(x, w1_ref[...].astype(jnp.float32),
                preferred_element_type=jnp.float32)
    h = jnp.maximum(h + b1_ref[...].astype(jnp.float32), 0.0)
    # TODO(synk): nn.Dropout(p=1e-5) is treated as identity (eval-mode
    # forward); training-mode random dropout is not reproduced in-kernel.

    # --- Hidden sparse (masked) linear layers + ReLU (static unroll) ------
    for l in range(num_hidden):
        w = wh_ref[l].astype(jnp.float32) * mh_ref[l].astype(jnp.float32)
        h = jnp.dot(h, w, preferred_element_type=jnp.float32)
        h = jnp.maximum(h + bh_ref[l].astype(jnp.float32), 0.0)

    # --- Final Linear: width -> 1 ------------------------------------------
    out = jnp.dot(h, we_ref[...].astype(jnp.float32),
                  preferred_element_type=jnp.float32)
    out_ref[...] = (out + be_ref[...].astype(jnp.float32)).astype(out_ref.dtype)


def _pick_batch_tile(b: int) -> int:
    for cand in (512, 256, 128, 64, 32, 16, 8):
        if b >= cand:
            return cand
    return 8


# --------------------------------------------------------------------------
# Wrapper: parameter layout + pallas_call.
# --------------------------------------------------------------------------
def dqnet_sparse_forward(x: jax.Array, params: dict) -> jax.Array:
    w1, b1 = params["w1"], params["b1"]          # (W, D), (W,)
    wh, mh, bh = params["wh"], params["mh"], params["bh"]  # (L,W,W),(L,W,W),(L,W)
    we, be = params["we"], params["be"]          # (1, W), (1,)

    B, D = x.shape
    L, W, _ = wh.shape

    TB = _pick_batch_tile(B)
    padB = ((B + TB - 1) // TB) * TB
    xp = x.astype(jnp.float32)
    if padB != B:                                # pad only when actually ragged
        xp = jnp.pad(xp, ((0, padB - B), (0, 0)))

    # Kernel-friendly (no in-kernel transpose) layouts.
    w1t = w1.T.astype(jnp.float32)                              # (D, W)
    b1r = b1.reshape(1, W).astype(jnp.float32)                  # (1, W)
    wht = jnp.transpose(wh, (0, 2, 1)).astype(jnp.float32)      # (L, W, W) in->out
    mht = jnp.transpose(mh, (0, 2, 1)).astype(jnp.float32)      # (L, W, W) in->out
    bhr = bh.reshape(L, 1, W).astype(jnp.float32)               # (L, 1, W)
    wet = we.T.astype(jnp.float32)                              # (W, 1)
    ber = be.reshape(1, 1).astype(jnp.float32)                  # (1, 1)

    grid = (padB // TB,)
    kernel = functools.partial(_dqnet_kernel, num_hidden=L)

    out = pl.pallas_call(
        kernel,
        out_shape=jax.ShapeDtypeStruct((padB, 1), jnp.float32),
        grid_spec=pltpu.PrefetchScalarGridSpec(
            num_scalar_prefetch=0,
            grid=grid,
            in_specs=[
                pl.BlockSpec((TB, D), lambda i: (i, 0)),        # x batch tile
                pl.BlockSpec((D, W), lambda i: (0, 0)),         # W1^T (resident)
                pl.BlockSpec((1, W), lambda i: (0, 0)),         # b1
                pl.BlockSpec((L, W, W), lambda i: (0, 0, 0)),   # hidden weights
                pl.BlockSpec((L, W, W), lambda i: (0, 0, 0)),   # hidden masks
                pl.BlockSpec((L, 1, W), lambda i: (0, 0, 0)),   # hidden biases
                pl.BlockSpec((W, 1), lambda i: (0, 0)),         # W_end^T
                pl.BlockSpec((1, 1), lambda i: (0, 0)),         # b_end
            ],
            out_specs=pl.BlockSpec((TB, 1), lambda i: (i, 0)),
        ),
        compiler_params=pltpu.CompilerParams(
            dimension_semantics=("parallel",),   # megacore-shard batch on v7x
        ),
    )(xp, w1t, b1r, wht, mht, bhr, wet, ber)

    return out[:B]


class DqNetSparsePallas:
    """JAX/Pallas mirror of the PyTorch `dqNetSparse` module (forward pass)."""

    def __init__(self, dim_nonpar, nodes, sparse_ratio, key,
                 bias=True, dropout=1e-5):
        self.num_hid_layer = nodes[0]
        self.width = nodes[1]
        L, W, D = self.num_hid_layer, self.width, dim_nonpar

        k = jax.random.split(key, 7)
        stdv1 = 1.0 / math.sqrt(D)
        stdvh = 1.0 / math.sqrt(W)

        w1 = jax.random.uniform(k[0], (W, D), jnp.float32, -stdv1, stdv1)
        b1 = jax.random.uniform(k[1], (W,), jnp.float32, -stdv1, stdv1)
        wh = jax.random.uniform(k[2], (L, W, W), jnp.float32, -stdvh, stdvh)
        bh = jax.random.uniform(k[3], (L, W), jnp.float32, -stdvh, stdvh)
        # gen_mask equivalent: ~sparse_ratio fraction of zero connections.
        mh = (jax.random.uniform(k[4], (L, W, W)) >= sparse_ratio
              ).astype(jnp.float32)
        we = jax.random.uniform(k[5], (1, W), jnp.float32, -stdvh, stdvh)
        be = jax.random.uniform(k[6], (1,), jnp.float32, -stdvh, stdvh)

        self.params = dict(w1=w1, b1=b1, wh=wh, mh=mh, bh=bh, we=we, be=be)

    def __call__(self, x: jax.Array) -> jax.Array:
        return dqnet_sparse_forward(x, self.params)


# --------------------------------------------------------------------------
# Pure-JAX reference (matches the PyTorch forward in eval mode).
# --------------------------------------------------------------------------
def _dqnet_ref(x, params):
    h = jnp.maximum(x @ params["w1"].T + params["b1"], 0.0)
    L = params["wh"].shape[0]
    for l in range(L):
        w = params["wh"][l] * params["mh"][l]
        h = jnp.maximum(h @ w.T + params["bh"][l], 0.0)
    return h @ params["we"].T + params["be"]


if __name__ == "__main__":
    key = jax.random.PRNGKey(0)
    kp, kx = jax.random.split(key)

    dim_nonpar = 32
    nodes = (2, 128)          # (num_hid_layer, width)
    sparse_ratio = 0.5
    batch = 8

    model = DqNetSparsePallas(dim_nonpar, nodes, sparse_ratio, key=kp)
    x = jax.random.normal(kx, (batch, dim_nonpar), dtype=jnp.float32)

    out = model(x)
    out = jax.block_until_ready(out)

    ref = _dqnet_ref(x, model.params)
    assert out.shape == (batch, 1), out.shape
    assert jnp.allclose(out, ref, rtol=5e-4, atol=5e-4), (out, ref)

    print("KERNEL_OK")
</pallas_src>

<mosaic_0001>
module attributes {stable_mosaic.version = 11 : i64} {
  func.func @_dqnet_kernel(%arg0: i32, %arg1: memref<8x32xf32, #tpu.memory_space<vmem>>, %arg2: memref<32x128xf32, #tpu.memory_space<vmem>>, %arg3: memref<1x128xf32, #tpu.memory_space<vmem>>, %arg4: memref<2x128x128xf32, #tpu.memory_space<vmem>>, %arg5: memref<2x128x128xf32, #tpu.memory_space<vmem>>, %arg6: memref<2x1x128xf32, #tpu.memory_space<vmem>>, %arg7: memref<128x1xf32, #tpu.memory_space<vmem>>, %arg8: memref<1x1xf32, #tpu.memory_space<vmem>>, %arg9: memref<8x1xf32, #tpu.memory_space<vmem>>) attributes {dimension_semantics = [#tpu.dimension_semantics<parallel>], iteration_bounds = array<i64: 1>, scalar_prefetch = 0 : i64, scratch_operands = 0 : i64, tpu.core_type = #tpu.core_type<tc>, window_params = [{transform_indices = @transform_0, window_bounds = array<i64: 8, 32>}, {pipeline_mode = #tpu.pipeline_mode<synchronous>, transform_indices = @transform_1, window_bounds = array<i64: 32, 128>}, {pipeline_mode = #tpu.pipeline_mode<synchronous>, transform_indices = @transform_2, window_bounds = array<i64: 1, 128>}, {pipeline_mode = #tpu.pipeline_mode<synchronous>, transform_indices = @transform_3, window_bounds = array<i64: 2, 128, 128>}, {pipeline_mode = #tpu.pipeline_mode<synchronous>, transform_indices = @transform_4, window_bounds = array<i64: 2, 128, 128>}, {pipeline_mode = #tpu.pipeline_mode<synchronous>, transform_indices = @transform_5, window_bounds = array<i64: 2, 1, 128>}, {pipeline_mode = #tpu.pipeline_mode<synchronous>, transform_indices = @transform_6, window_bounds = array<i64: 128, 1>}, {pipeline_mode = #tpu.pipeline_mode<synchronous>, transform_indices = @transform_7, window_bounds = array<i64: 1, 1>}, {transform_indices = @transform_8, window_bounds = array<i64: 8, 1>}]} {
    %c0 = arith.constant 0 : index
    %c0_0 = arith.constant 0 : index
    %0 = vector.load %arg1[%c0, %c0_0] : memref<8x32xf32, #tpu.memory_space<vmem>>, vector<8x32xf32>
    %c0_1 = arith.constant 0 : index
    %c0_2 = arith.constant 0 : index
    %1 = vector.load %arg2[%c0_1, %c0_2] : memref<32x128xf32, #tpu.memory_space<vmem>>, vector<32x128xf32>
    %cst = arith.constant dense<0.000000e+00> : vector<8x128xf32>
    %2 = tpu.matmul %0, %1, %cst {dimension_numbers = #tpu.dot_dimension_numbers<[1], [0], [0], [1], [0, 0, 1, 1], [], []>} : vector<8x32xf32>, vector<32x128xf32>, vector<8x128xf32> -> vector<8x128xf32>
    %c0_3 = arith.constant 0 : index
    %c0_4 = arith.constant 0 : index
    %3 = vector.load %arg3[%c0_3, %c0_4] : memref<1x128xf32, #tpu.memory_space<vmem>>, vector<1x128xf32>
    %4 = vector.broadcast %3 : vector<1x128xf32> to vector<8x128xf32>
    %5 = arith.addf %2, %4 : vector<8x128xf32>
    %cst_5 = arith.constant 0.000000e+00 : f32
    %6 = vector.broadcast %cst_5 : f32 to vector<8x128xf32>
    %7 = arith.maximumf %5, %6 : vector<8x128xf32>
    %c0_6 = arith.constant 0 : index
    %c0_7 = arith.constant 0 : index
    %c0_8 = arith.constant 0 : index
    %8 = vector.load %arg4[%c0_6, %c0_7, %c0_8] : memref<2x128x128xf32, #tpu.memory_space<vmem>>, vector<1x128x128xf32>
    %9 = vector.shape_cast %8 : vector<1x128x128xf32> to vector<128x128xf32>
    %c0_9 = arith.constant 0 : index
    %c0_10 = arith.constant 0 : index
    %c0_11 = arith.constant 0 : index
    %10 = vector.load %arg5[%c0_9, %c0_10, %c0_11] : memref<2x128x128xf32, #tpu.memory_space<vmem>>, vector<1x128x128xf32>
    %11 = vector.shape_cast %10 : vector<1x128x128xf32> to vector<128x128xf32>
    %12 = arith.mulf %9, %11 : vector<128x128xf32>
    %cst_12 = arith.constant dense<0.000000e+00> : vector<8x128xf32>
    %13 = tpu.matmul %7, %12, %cst_12 {dimension_numbers = #tpu.dot_dimension_numbers<[1], [0], [0], [1], [0, 0, 1, 1], [], []>} : vector<8x128xf32>, vector<128x128xf32>, vector<8x128xf32> -> vector<8x128xf32>
    %c0_13 = arith.constant 0 : index
    %c0_14 = arith.constant 0 : index
    %c0_15 = arith.constant 0 : index
    %14 = vector.load %arg6[%c0_13, %c0_14, %c0_15] : memref<2x1x128xf32, #tpu.memory_space<vmem>>, vector<1x1x128xf32>
    %15 = vector.shape_cast %14 : vector<1x1x128xf32> to vector<1x128xf32>
    %16 = vector.broadcast %15 : vector<1x128xf32> to vector<8x128xf32>
    %17 = arith.addf %13, %16 : vector<8x128xf32>
    %cst_16 = arith.constant 0.000000e+00 : f32
    %18 = vector.broadcast %cst_16 : f32 to vector<8x128xf32>
    %19 = arith.maximumf %17, %18 : vector<8x128xf32>
    %c1 = arith.constant 1 : index
    %c0_17 = arith.constant 0 : index
    %c0_18 = arith.constant 0 : index
    %20 = vector.load %arg4[%c1, %c0_17, %c0_18] : memref<2x128x128xf32, #tpu.memory_space<vmem>>, vector<1x128x128xf32>
    %21 = vector.shape_cast %20 : vector<1x128x128xf32> to vector<128x128xf32>
    %c1_19 = arith.constant 1 : index
    %c0_20 = arith.constant 0 : index
    %c0_21 = arith.constant 0 : index
    %22 = vector.load %arg5[%c1_19, %c0_20, %c0_21] : memref<2x128x128xf32, #tpu.memory_space<vmem>>, vector<1x128x128xf32>
    %23 = vector.shape_cast %22 : vector<1x128x128xf32> to vector<128x128xf32>
    %24 = arith.mulf %21, %23 : vector<128x128xf32>
    %cst_22 = arith.constant dense<0.000000e+00> : vector<8x128xf32>
    %25 = tpu.matmul %19, %24, %cst_22 {dimension_numbers = #tpu.dot_dimension_numbers<[1], [0], [0], [1], [0, 0, 1, 1], [], []>} : vector<8x128xf32>, vector<128x128xf32>, vector<8x128xf32> -> vector<8x128xf32>
    %c1_23 = arith.constant 1 : index
    %c0_24 = arith.constant 0 : index
    %c0_25 = arith.constant 0 : index
    %26 = vector.load %arg6[%c1_23, %c0_24, %c0_25] : memref<2x1x128xf32, #tpu.memory_space<vmem>>, vector<1x1x128xf32>
    %27 = vector.shape_cast %26 : vector<1x1x128xf32> to vector<1x128xf32>
    %28 = vector.broadcast %27 : vector<1x128xf32> to vector<8x128xf32>
    %29 = arith.addf %25, %28 : vector<8x128xf32>
    %cst_26 = arith.constant 0.000000e+00 : f32
    %30 = vector.broadcast %cst_26 : f32 to vector<8x128xf32>
    %31 = arith.maximumf %29, %30 : vector<8x128xf32>
    %c0_27 = arith.constant 0 : index
    %c0_28 = arith.constant 0 : index
    %32 = vector.load %arg7[%c0_27, %c0_28] : memref<128x1xf32, #tpu.memory_space<vmem>>, vector<128x1xf32>
    %cst_29 = arith.constant dense<0.000000e+00> : vector<8x1xf32>
    %33 = tpu.matmul %31, %32, %cst_29 {dimension_numbers = #tpu.dot_dimension_numbers<[1], [0], [0], [1], [0, 0, 1, 1], [], []>} : vector<8x128xf32>, vector<128x1xf32>, vector<8x1xf32> -> vector<8x1xf32>
    %c0_30 = arith.constant 0 : index
    %c0_31 = arith.constant 0 : index
    %34 = vector.load %arg8[%c0_30, %c0_31] : memref<1x1xf32, #tpu.memory_space<vmem>>, vector<1x1xf32>
    %35 = vector.broadcast %34 : vector<1x1xf32> to vector<8x1xf32>
    %36 = arith.addf %33, %35 : vector<8x1xf32>
    %c0_32 = arith.constant 0 : index
    %c0_33 = arith.constant 0 : index
    %37 = vector.load %arg9[%c0_32, %c0_33] : memref<8x1xf32, #tpu.memory_space<vmem>>, vector<8x1xf32>
    tpu.vector_store %arg9[%c0_32, %c0_33], %36 {strides = array<i32>} : memref<8x1xf32, #tpu.memory_space<vmem>>, vector<8x1xf32>,
    return
  }
  func.func @transform_0(%arg0: i32) -> (i32, i32) {
    %c0_i32 = arith.constant 0 : i32
    %c0_i32_0 = arith.constant 0 : i32
    return %arg0, %c0_i32 : i32, i32
  }
  func.func @transform_1(%arg0: i32) -> (i32, i32) {
    %c0_i32 = arith.constant 0 : i32
    %c0_i32_0 = arith.constant 0 : i32
    %c0_i32_1 = arith.constant 0 : i32
    return %c0_i32, %c0_i32_0 : i32, i32
  }
  func.func @transform_2(%arg0: i32) -> (i32, i32) {
    %c0_i32 = arith.constant 0 : i32
    %c0_i32_0 = arith.constant 0 : i32
    %c0_i32_1 = arith.constant 0 : i32
    return %c0_i32, %c0_i32_0 : i32, i32
  }
  func.func @transform_3(%arg0: i32) -> (i32, i32, i32) {
    %c0_i32 = arith.constant 0 : i32
    %c0_i32_0 = arith.constant 0 : i32
    %c0_i32_1 = arith.constant 0 : i32
    %c0_i32_2 = arith.constant 0 : i32
    return %c0_i32, %c0_i32_0, %c0_i32_1 : i32, i32, i32
  }
  func.func @transform_4(%arg0: i32) -> (i32, i32, i32) {
    %c0_i32 = arith.constant 0 : i32
    %c0_i32_0 = arith.constant 0 : i32
    %c0_i32_1 = arith.constant 0 : i32
    %c0_i32_2 = arith.constant 0 : i32
    return %c0_i32, %c0_i32_0, %c0_i32_1 : i32, i32, i32
  }
  func.func @transform_5(%arg0: i32) -> (i32, i32, i32) {
    %c0_i32 = arith.constant 0 : i32
    %c0_i32_0 = arith.constant 0 : i32
    %c0_i32_1 = arith.constant 0 : i32
    %c0_i32_2 = arith.constant 0 : i32
    return %c0_i32, %c0_i32_0, %c0_i32_1 : i32, i32, i32
  }
  func.func @transform_6(%arg0: i32) -> (i32, i32) {
    %c0_i32 = arith.constant 0 : i32
    %c0_i32_0 = arith.constant 0 : i32
    %c0_i32_1 = arith.constant 0 : i32
    return %c0_i32, %c0_i32_0 : i32, i32
  }
  func.func @transform_7(%arg0: i32) -> (i32, i32) {
    %c0_i32 = arith.constant 0 : i32
    %c0_i32_0 = arith.constant 0 : i32
    %c0_i32_1 = arith.constant 0 : i32
    return %c0_i32, %c0_i32_0 : i32, i32
  }
  func.func @transform_8(%arg0: i32) -> (i32, i32) {
    %c0_i32 = arith.constant 0 : i32
    %c0_i32_0 = arith.constant 0 : i32
    return %arg0, %c0_i32 : i32, i32
  }
}

</mosaic_0001>

<bundles_post_ra>
// kernel: tpu_custom_call.1
= control target key start
LH: loop header
LB: loop body
LE: loop exit
PB: predicated region body
PF: predicated region fallthrough
CT: control target
= control target key end

     0   :  { %s489_s0 = inlined_call_operand.vmem [shape: f32[8,32], index: 0, kind: input, shape index: {}]   ;;  %s490_s1 = inlined_call_operand.vmem [shape: f32[32,128], index: 1, kind: input, shape index: {}]   ;;  %s491_s2 = inlined_call_operand.vmem [shape: f32[1,128], index: 2, kind: input, shape index: {}]   ;;  %s492_s3 = inlined_call_operand.hbm [shape: f32[2,128,128], index: 3, kind: input, shape index: {}]   ;;  %s493_s4 = inlined_call_operand.hbm [shape: f32[2,128,128], index: 4, kind: input, shape index: {}]   ;;  %s494_s5 = inlined_call_operand.vmem [shape: f32[2,1,128], index: 5, kind: input, shape index: {}]   ;;  %s495_s6 = inlined_call_operand.vmem [shape: f32[128,1], index: 6, kind: input, shape index: {}]   ;;  %s496_s7 = inlined_call_operand.<no memory space> [shape: f32[1,1], index: 7, kind: input, shape index: {}]   ;;  %s497_s8 = inlined_call_operand.vmem [shape: f32[8,1], index: 8, kind: output, shape index: {}]  }
   0x1   :  { %v13_v0 = vstv %s496_s7 }
   0x2   :  { %14 = vst [vmem:[#allocation2] sm:$0x1] %v13_v0 }
   0x3   :  { %15 = vsyncpa [#allocation4], 0  ;;  %s27_s9 = sshll.u32 %s492_s3, 4  ;;  %s28_s9 = int_to_ptr.hbm [resolvable:$true] %s27_s9 }
   0x4   :  { %16 = vsyncpa [#allocation6], 0  ;;  %s356_s10 = smov [#allocation3]   ;;  %s40_s14 = sshll.u32 %s493_s4, 4  ;;  %s41_s14 = int_to_ptr.hbm [resolvable:$true] %s40_s14 }
   0x5   :  { %s29_s11 = sshll.u32 %s356_s10, 4  ;;  %s357_s15 = smov 128   ;;  %s30_s11 = int_to_ptr.vmem [resolvable:$true] %s29_s11 }
   0x6   :  { %s358_s16 = smov 8   ;;  %s359_s7 = smov [#allocation5]  }
   0x7   :  { %35 = dma.hbm_to_vmem [thread:$0]  %s28_s9, 4096, %s30_s11, [#allocation4], %s357_s15, %s357_s15, %s358_s16  }
   0x8   :  { %s42_s17 = sshll.u32 %s359_s7, 4  ;;  %s43_s17 = int_to_ptr.vmem [resolvable:$true] %s42_s17 }
   0x9   :  { %48 = dma.hbm_to_vmem [thread:$0]  %s41_s14, 4096, %s43_s17, [#allocation6], %s357_s15, %s357_s15, %s358_s16  }
   0xa   :  { %352 = dma.done.wait [#allocation4], 4096  }
   0xb   :  { %353 = vsyncadd [#allocation4], 4294963200 }
   0xc   :  { %354 = dma.done.wait [#allocation6], 4096  }
   0xd   :  { %355 = vsyncadd [#allocation6], 4294963200  ;;  %v67_v1 = vld [vmem:[%s490_s1 + $0x18] sm:$0xff]  ;;  %v66_v2 = vld [vmem:[%s490_s1 + $0x10] sm:$0xff]  ;;  %vm72_vm0 = vcmask 261120   ;;  %vm286_vm1 = vcmask 7168  }
   0xe   :  { %88 = vmatpush.msra.mxu0 %v67_v1  ;;  %v65_v3 = vld [vmem:[%s490_s1 + $0x8] sm:$0xff]  ;;  %v112_v4 = vld [vmem:[#allocation3 + $0x78] sm:$0xff]  ;;  %v111_v6 = vld [vmem:[#allocation3 + $0x70] sm:$0xff] }
   0xf   :  { %v128_v5 = vld [vmem:[#allocation5 + $0x78] sm:$0xff]  ;;  %v127_v7 = vld [vmem:[#allocation5 + $0x70] sm:$0xff]  ;;  %v110_v10 = vld [vmem:[#allocation3 + $0x68] sm:$0xff] }
  0x10   :  { %89 = vmatpush.msra.mxu0 %v66_v2  ;;  %v144_v8 = vmul.f32 %v128_v5, %v112_v4  ;;  %v143_v9 = vmul.f32 %v127_v7, %v111_v6  ;;  %v126_v11 = vld [vmem:[#allocation5 + $0x68] sm:$0xff]  ;;  %v64_v12 = vld [vmem:[%s490_s1] sm:$0xff]  ;;  %v107_v20 = vld [vmem:[#allocation3 + $0x50] sm:$0xff] }
  0x11   :  { %v109_v13 = vld [vmem:[#allocation3 + $0x60] sm:$0xff]  ;;  %v142_v16 = vmul.f32 %v126_v11, %v110_v10  ;;  %v108_v17 = vld [vmem:[#allocation3 + $0x58] sm:$0xff]  ;;  %v123_v21 = vld [vmem:[#allocation5 + $0x50] sm:$0xff] }
  0x12   :  { %v125_v14 = vld [vmem:[#allocation5 + $0x60] sm:$0xff]  ;;  %90 = vmatpush.msra.mxu0 %v65_v3  ;;  %149 = vmatpush.msra.mxu1 %v144_v8  ;;  %v124_v18 = vld [vmem:[#allocation5 + $0x58] sm:$0xff]  ;;  %v106_v23 = vld [vmem:[#allocation3 + $0x48] sm:$0xff]  ;;  %v139_v25 = vmul.f32 %v123_v21, %v107_v20 }
  0x13   :  { %v63_v15 = vld [vmem:[%s489_s0] sm:$0xff]  ;;  %v141_v19 = vmul.f32 %v125_v14, %v109_v13  ;;  %v140_v22 = vmul.f32 %v124_v18, %v108_v17  ;;  %v122_v24 = vld [vmem:[#allocation5 + $0x48] sm:$0xff]  ;;  %v103_v32 = vld [vmem:[#allocation3 + $0x30] sm:$0xff] }
  0x14   :  { %91 = vmatpush.msra.mxu0 %v64_v12  ;;  %150 = vmatpush.msra.mxu1 %v143_v9  ;;  %v105_v26 = vld [vmem:[#allocation3 + $0x40] sm:$0xff]  ;;  %v138_v28 = vmul.f32 %v122_v24, %v106_v23  ;;  %v104_v29 = vld [vmem:[#allocation3 + $0x38] sm:$0xff]  ;;  %v119_v33 = vld [vmem:[#allocation5 + $0x30] sm:$0xff] }
  0x15   :  { %294 = vmatmul.msk.f32.vlgmr.msra.gmra.mxu0 %vm72_vm0, %v63_v15  ;;  %v121_v27 = vld [vmem:[#allocation5 + $0x40] sm:$0xff]  ;;  %v120_v30 = vld [vmem:[#allocation5 + $0x38] sm:$0xff]  ;;  %v102_v35 = vld [vmem:[#allocation3 + $0x28] sm:$0xff]  ;;  %v135_v37 = vmul.f32 %v119_v33, %v103_v32 }
  0x16   :  { %151 = vmatpush.msra.mxu1 %v142_v16  ;;  %v137_v31 = vmul.f32 %v121_v27, %v105_v26  ;;  %v136_v34 = vmul.f32 %v120_v30, %v104_v29  ;;  %v118_v36 = vld [vmem:[#allocation5 + $0x28] sm:$0xff]  ;;  %v101_v38 = vld [vmem:[#allocation3 + $0x20] sm:$0xff]  ;;  %v100_v41 = vld [vmem:[#allocation3 + $0x18] sm:$0xff] }
  0x17   :  { %v117_v39 = vld [vmem:[#allocation5 + $0x20] sm:$0xff]  ;;  %v134_v40 = vmul.f32 %v118_v36, %v102_v35  ;;  %v116_v42 = vld [vmem:[#allocation5 + $0x18] sm:$0xff]  ;;  %v99_v45 = vld [vmem:[#allocation3 + $0x10] sm:$0xff] }
  0x18   :  { %152 = vmatpush.msra.mxu1 %v141_v19  ;;  %v133_v43 = vmul.f32 %v117_v39, %v101_v38  ;;  %v132_v44 = vmul.f32 %v116_v42, %v100_v41  ;;  %v115_v46 = vld [vmem:[#allocation5 + $0x10] sm:$0xff]  ;;  %v98_v48 = vld [vmem:[#allocation3 + $0x8] sm:$0xff]  ;;  %v97_v51 = vld [vmem:[#allocation3] sm:$0xff] }
  0x19   :  { %v131_v47 = vmul.f32 %v115_v46, %v99_v45  ;;  %v114_v49 = vld [vmem:[#allocation5 + $0x8] sm:$0xff]  ;;  %v113_v52 = vld [vmem:[#allocation5] sm:$0xff]  ;;  %v186_v54 = vld [vmem:[#allocation3 + $0xf8] sm:$0xff] }
  0x1a   :  { %153 = vmatpush.msra.mxu1 %v140_v22  ;;  %v130_v50 = vmul.f32 %v114_v49, %v98_v48  ;;  %v129_v53 = vmul.f32 %v113_v52, %v97_v51  ;;  %v203_v55 = vld [vmem:[#allocation5 + $0xf8] sm:$0xff]  ;;  %v185_v56 = vld [vmem:[#allocation3 + $0xf0] sm:$0xff]  ;;  %v184_v59 = vld [vmem:[#allocation3 + $0xe8] sm:$0xff] }
  0x1b   :  { %v219_v57 = vmul.f32 %v203_v55, %v186_v54  ;;  %v202_v58 = vld [vmem:[#allocation5 + $0xf0] sm:$0xff]  ;;  %v201_v60 = vld [vmem:[#allocation5 + $0xe8] sm:$0xff]  ;;  %v183_v62 = vld [vmem:[#allocation3 + $0xe0] sm:$0xff] }
  0x1c   :  { %154 = vmatpush.msra.mxu1 %v139_v25  ;;  %v218_v61 = vmul.f32 %v202_v58, %v185_v56  ;;  %v200_v63 = vld [vmem:[#allocation5 + $0xe0] sm:$0xff]  ;;  %v217_v0 = vmul.f32 %v201_v60, %v184_v59  ;;  %v182_v1 = vld [vmem:[#allocation3 + $0xd8] sm:$0xff]  ;;  %v181_v4 = vld [vmem:[#allocation3 + $0xd0] sm:$0xff] }
  0x1d   :  { %225 = vmatpush.msra.mxu2 %v219_v57  ;;  %v199_v2 = vld [vmem:[#allocation5 + $0xd8] sm:$0xff]  ;;  %v216_v3 = vmul.f32 %v200_v63, %v183_v62  ;;  %v198_v5 = vld [vmem:[#allocation5 + $0xd0] sm:$0xff]  ;;  %v180_v7 = vld [vmem:[#allocation3 + $0xc8] sm:$0xff] }
  0x1e   :  { %155 = vmatpush.msra.mxu1 %v138_v28  ;;  %v215_v6 = vmul.f32 %v199_v2, %v182_v1  ;;  %v197_v8 = vld [vmem:[#allocation5 + $0xc8] sm:$0xff]  ;;  %v214_v9 = vmul.f32 %v198_v5, %v181_v4  ;;  %v179_v10 = vld [vmem:[#allocation3 + $0xc0] sm:$0xff]  ;;  %v178_v13 = vld [vmem:[#allocation3 + $0xb8] sm:$0xff] }
  0x1f   :  { %226 = vmatpush.msra.mxu2 %v218_v61  ;;  %v196_v11 = vld [vmem:[#allocation5 + $0xc0] sm:$0xff]  ;;  %v213_v12 = vmul.f32 %v197_v8, %v180_v7  ;;  %v195_v14 = vld [vmem:[#allocation5 + $0xb8] sm:$0xff]  ;;  %v177_v16 = vld [vmem:[#allocation3 + $0xb0] sm:$0xff] }
  0x20   :  { %156 = vmatpush.msra.mxu1 %v137_v31  ;;  %v212_v15 = vmul.f32 %v196_v11, %v179_v10  ;;  %v194_v17 = vld [vmem:[#allocation5 + $0xb0] sm:$0xff]  ;;  %v211_v18 = vmul.f32 %v195_v14, %v178_v13  ;;  %v176_v19 = vld [vmem:[#allocation3 + $0xa8] sm:$0xff]  ;;  %v175_v22 = vld [vmem:[#allocation3 + $0xa0] sm:$0xff] }
  0x21   :  { %227 = vmatpush.msra.mxu2 %v217_v0  ;;  %v193_v20 = vld [vmem:[#allocation5 + $0xa8] sm:$0xff]  ;;  %v210_v21 = vmul.f32 %v194_v17, %v177_v16  ;;  %v192_v23 = vld [vmem:[#allocation5 + $0xa0] sm:$0xff]  ;;  %v174_v25 = vld [vmem:[#allocation3 + $0x98] sm:$0xff] }
  0x22   :  { %157 = vmatpush.msra.mxu1 %v136_v34  ;;  %v209_v24 = vmul.f32 %v193_v20, %v176_v19  ;;  %v191_v26 = vld [vmem:[#allocation5 + $0x98] sm:$0xff]  ;;  %v208_v27 = vmul.f32 %v192_v23, %v175_v22  ;;  %v173_v33 = vld [vmem:[#allocation3 + $0x90] sm:$0xff]  ;;  %v172_v36 = vld [vmem:[#allocation3 + $0x88] sm:$0xff] }
  0x23   :  { %228 = vmatpush.msra.mxu2 %v216_v3  ;;  %v207_v28 = vmul.f32 %v191_v26, %v174_v25  ;;  %v300_v29 = vld [vmem:[%s491_s2] ss:$0 sm:$0xff]  ;;  %v190_v34 = vld [vmem:[#allocation5 + $0x90] sm:$0xff]  ;;  %v171_v39 = vld [vmem:[#allocation3 + $0x80] sm:$0xff] }
  0x24   :  { %158 = vmatpush.msra.mxu1 %v135_v37  ;;  %v206_v35 = vmul.f32 %v190_v34, %v173_v33  ;;  %v189_v37 = vld [vmem:[#allocation5 + $0x88] sm:$0xff]  ;;  %v261_v42 = vld [vmem:[%s495_s6 + $0x78] sm:$0xff]  ;;  %v258_v45 = vld [vmem:[%s495_s6 + $0x60] sm:$0xff] }
  0x25   :  { %229 = vmatpush.msra.mxu2 %v215_v6  ;;  %v205_v38 = vmul.f32 %v189_v37, %v172_v36  ;;  %266 = vmatpush.msra.mxu3 %v261_v42  ;;  %v257_v46 = vld [vmem:[%s495_s6 + $0x58] sm:$0xff]  ;;  %v255_v48 = vld [vmem:[%s495_s6 + $0x48] sm:$0xff]  ;;  %v254_v49 = vld [vmem:[%s495_s6 + $0x40] sm:$0xff] }
  0x26   :  { %159 = vmatpush.msra.mxu1 %v134_v40  ;;  %v188_v40 = vld [vmem:[#allocation5 + $0x80] sm:$0xff]  ;;  %v252_v51 = vld [vmem:[%s495_s6 + $0x30] sm:$0xff]  ;;  %v249_v54 = vld [vmem:[%s495_s6 + $0x18] sm:$0xff] }
  0x27   :  { %230 = vmatpush.msra.mxu2 %v214_v9  ;;  %v204_v41 = vmul.f32 %v188_v40, %v171_v39  ;;  %v251_v52 = vld [vmem:[%s495_s6 + $0x28] sm:$0xff]  ;;  %v301_v55 = vld [vmem:[%s494_s5] ss:$0 sm:$0xff]  ;;  %v248_v59 = vld [vmem:[%s495_s6 + $0x10] sm:$0xff] }
  0x28   :  { %160 = vmatpush.msra.mxu1 %v133_v43  ;;  %v260_v43 = vld [vmem:[%s495_s6 + $0x70] sm:$0xff]  ;;  %v247_v60 = vld [vmem:[%s495_s6 + $0x8] sm:$0xff]  ;;  %v246_v61 = vld [vmem:[%s495_s6] sm:$0xff] }
  0x29   :  { %231 = vmatpush.msra.mxu2 %v213_v12  ;;  %267 = vmatpush.msra.mxu3 %v260_v43  ;;  %v302_v62 = vld [vmem:[%s494_s5 + $0x1] ss:$0 sm:$0xff]  ;;  %v303_v2 = vld [vmem:[#allocation2] ss:$0 sm:$0xff] }
  0x2a   :  { %161 = vmatpush.msra.mxu1 %v132_v44  ;;  %v259_v44 = vld [vmem:[%s495_s6 + $0x68] sm:$0xff] }
  0x2b   :  { %232 = vmatpush.msra.mxu2 %v212_v15  ;;  %268 = vmatpush.msra.mxu3 %v259_v44 }
  0x2c   :  { %162 = vmatpush.msra.mxu1 %v131_v47  ;;  %v256_v47 = vld [vmem:[%s495_s6 + $0x50] sm:$0xff] }
  0x2d   :  { %233 = vmatpush.msra.mxu2 %v211_v18  ;;  %269 = vmatpush.msra.mxu3 %v258_v45 }
  0x2e   :  { %163 = vmatpush.msra.mxu1 %v130_v50  ;;  %v253_v50 = vld [vmem:[%s495_s6 + $0x38] sm:$0xff] }
  0x2f   :  { %234 = vmatpush.msra.mxu2 %v210_v21  ;;  %270 = vmatpush.msra.mxu3 %v257_v46 }
  0x30   :  { %164 = vmatpush.msra.mxu1 %v129_v53  ;;  %v250_v53 = vld [vmem:[%s495_s6 + $0x20] sm:$0xff] }
  0x31   :  { %235 = vmatpush.msra.mxu2 %v209_v24  ;;  %271 = vmatpush.msra.mxu3 %v256_v47 }
  0x33   :  { %236 = vmatpush.msra.mxu2 %v208_v27  ;;  %272 = vmatpush.msra.mxu3 %v255_v48 }
  0x35   :  { %237 = vmatpush.msra.mxu2 %v207_v28  ;;  %273 = vmatpush.msra.mxu3 %v254_v49 }
  0x37   :  { %238 = vmatpush.msra.mxu2 %v206_v35  ;;  %274 = vmatpush.msra.mxu3 %v253_v50 }
  0x39   :  { %239 = vmatpush.msra.mxu2 %v205_v38  ;;  %275 = vmatpush.msra.mxu3 %v252_v51 }
  0x3b   :  { %240 = vmatpush.msra.mxu2 %v204_v41  ;;  %276 = vmatpush.msra.mxu3 %v251_v52 }
  0x3d   :  { %277 = vmatpush.msra.mxu3 %v250_v53 }
  0x3f   :  { %278 = vmatpush.msra.mxu3 %v249_v54 }
  0x41   :  { %279 = vmatpush.msra.mxu3 %v248_v59 }
  0x43   :  { %280 = vmatpush.msra.mxu3 %v247_v60 }
  0x45   :  { %281 = vmatpush.msra.mxu3 %v246_v61 }
  0x92   :  { %v93_v30 = vpop.f32.mrf.mxu0 }
  0x93   :  { %v94_v31 = vadd.f32 %v300_v29, %v93_v30 }
  0x95   :  { %v96_v32 = vmax.f32 %v94_v31, 0.0 }
  0x97   :  { %165 = vmatmul.f32.vlgmr.msra.gmra.mxu1 %v96_v32 }
 0x114   :  { %v166_v56 = vpop.f32.mrf.mxu1 }
 0x115   :  { %v167_v57 = vadd.f32 %v301_v55, %v166_v56 }
 0x117   :  { %v169_v58 = vmax.f32 %v167_v57, 0.0 }
 0x119   :  { %241 = vmatmul.f32.vlgmr.msra.gmra.mxu2 %v169_v58 }
 0x19c   :  { %v242_v63 = vpop.f32.mrf.mxu2 }
 0x19d   :  { %v243_v0 = vadd.f32 %v302_v62, %v242_v63 }
 0x19f   :  { %v245_v1 = vmax.f32 %v243_v0, 0.0 }
 0x1a1   :  { %282 = vmatmul.f32.vlgmr.msra.gmra.mxu3 %v245_v1 }
 0x224   :  { %v283_v3 = vpop.f32.mrf.mxu3 }
 0x225   :  { %v284_v4 = vadd.f32 %v303_v2, %v283_v3 }
 0x227   :  { %287 = vst.msk [vmem:[%s497_s8] sm:$0xff] %vm286_vm1, %v284_v4 }
 0x228   :  { %292 = vsyncpa [#allocation4], 1 }
 0x229   :  { %293 = vsyncpa [#allocation6], 1 }

</bundles_post_ra>
